<compile_context>
chip_gen: v7x
topology: tpu7x:2x2x1
jax: 0.10.0
libtpu: 0.0.40
codegen_flags: <defaults>
</compile_context>

<pallas_src>
import functools
import math

import jax
import jax.numpy as jnp
from jax import lax
from jax.experimental import pallas as pl
from jax.experimental.pallas import tpu as pltpu

LANES = 128
CHUNK_ROWS = 64            # in-kernel chunk: 64*128*4B = 32 KiB per f32 temp
_ROW_GRANULE = 64          # block_rows rounding unit (covers f32/bf16/int8 packing)
MAX_BLOCK_ROWS = 4096      # 4096*128*4B = 2 MiB per f32 input tile
VMEM_LIMIT_BYTES = 32 * 1024 * 1024  # explicit: fits v5e/v6e/v7x comfortably

# Constants from the PyTorch module.
WEIGHT_POS = 2.0
WEIGHT_NEG = 1.0
GAMMA = 2                  # compile-time constant -> explicit square below
MARGIN = 0.2
EM = math.exp(MARGIN)

# Padding logit (only used when numel % 128 != 0): softplus(-PAD) == 0 exactly
# in f32, so with truth == 1 padded elements contribute exactly zero loss.
PAD_LOGIT = 1e4


def _cdiv(a, b):
    return -(-a // b)


def _choose_block_rows(rows):
    """Pick block_rows so mid/large inputs get >=4 (even) pipelined grid steps."""
    if rows <= 2 * _ROW_GRANULE:
        # Tiny input: single full-extent block (nothing useful to pipeline).
        return rows
    target_blocks = max(4, _cdiv(rows, MAX_BLOCK_ROWS))
    if target_blocks % 2:
        target_blocks += 1                      # even -> balanced megacore split
    block_rows = _cdiv(rows, target_blocks)
    block_rows = _cdiv(block_rows, _ROW_GRANULE) * _ROW_GRANULE
    return min(block_rows, MAX_BLOCK_ROWS)


def _margin_focal_kernel(x_ref, t_ref, out_ref, *, total_rows, binary_truth):
    """Per-block partial sum of the margin-focal loss into a (1, 128) slab."""
    block_rows = x_ref.shape[0]                       # static
    chunk = min(CHUNK_ROWS, block_rows)
    num_chunks = block_rows // chunk                  # full chunks (static)
    rem_rows = block_rows - num_chunks * chunk        # static (0 by construction)
    needs_row_mask = (total_rows % block_rows) != 0   # static python bool

    if needs_row_mask:
        # Valid rows remaining in this block (>= block_rows except last block).
        row_limit = total_rows - pl.program_id(0) * block_rows

    def chunk_loss(row0, nrows):
        x = x_ref[pl.ds(row0, nrows), :].astype(jnp.float32)
        t = t_ref[pl.ds(row0, nrows), :].astype(jnp.float32)

        # softplus(-x) = -logsigmoid(x), numerically stable (1 exp + 1 log1p).
        e = jnp.exp(-jnp.abs(x))
        sp = jnp.maximum(-x, 0.0) + jnp.log1p(e)
        # log_prob = t*softplus(-x) + (1-t)*softplus(x) = softplus(-x) + (1-t)*x
        log_prob = sp + (1.0 - t) * x

        if binary_truth:
            # prob = t*sigmoid(x) + (1-t)*(1-sigmoid(x)); reuse e = exp(-|x|):
            # one approx vrcp + Newton step instead of a second full exp (EUP).
            d = 1.0 + e
            r = pl.reciprocal(d, approx=True)
            r = r * (2.0 - d * r)                     # Newton: ~f32 accuracy
            s = jnp.where(x >= 0.0, 1.0, e) * r       # sigmoid(x)
            prob = (1.0 - t) + (2.0 * t - 1.0) * s
        else:
            # Exact path (supports soft labels): prob = exp(-log_prob).
            prob = jnp.exp(-log_prob)

        margin_term = jnp.log(EM + (1.0 - EM) * prob)
        weight = (WEIGHT_POS - WEIGHT_NEG) * t + WEIGHT_NEG   # == 1 + t
        om = 1.0 - prob
        loss = margin_term + weight * (om * om) * log_prob    # GAMMA == 2

        if needs_row_mask:
            local_row = row0 + lax.broadcasted_iota(jnp.int32, (nrows, LANES), 0)
            loss = jnp.where(local_row < row_limit, loss, 0.0)

        # Lane-dense (1, 128) partial; sublane reduce is a cheap XLU op/chunk.
        return jnp.sum(loss, axis=0, keepdims=True)

    if num_chunks == 1 and rem_rows == 0:
        acc = chunk_loss(0, block_rows)
    else:
        def body(j, a):
            return a + chunk_loss(pl.multiple_of(j * chunk, chunk), chunk)
        acc = lax.fori_loop(0, num_chunks, body,
                            jnp.zeros((1, LANES), jnp.float32))
        if rem_rows:  # defensive: block_rows is always a multiple of `chunk`
            acc = acc + chunk_loss(num_chunks * chunk, rem_rows)

    out_ref[0] = acc


def margin_focal_loss(logit, truth, *, assume_binary_truth=True):
    """Pallas implementation of MarginFocalLoss.forward (returns scalar f32).

    assume_binary_truth=True uses a cheaper sigmoid-blend for prob (identical
    result for 0/1 labels); set False for soft labels (exact module math).
    """
    x = logit.reshape(-1)
    t = truth.reshape(-1)
    n = x.shape[0]

    # Only pad up to the next multiple of 128 lanes, and only if needed; the
    # common (divisible) case is a zero-copy reshape, no extra HBM pass.
    rem = (-n) % LANES
    if rem:
        pad_val = PAD_LOGIT
        if jnp.issubdtype(x.dtype, jnp.floating):
            pad_val = min(PAD_LOGIT, float(jnp.finfo(x.dtype).max))
        x = jnp.concatenate([x, jnp.full((rem,), pad_val, dtype=x.dtype)])
        t = jnp.concatenate([t, jnp.ones((rem,), dtype=t.dtype)])
    rows = (n + rem) // LANES

    block_rows = _choose_block_rows(rows)
    num_blocks = _cdiv(rows, block_rows)

    x2 = x.reshape(rows, LANES)
    t2 = t.reshape(rows, LANES)

    kernel = functools.partial(_margin_focal_kernel,
                               total_rows=rows,
                               binary_truth=bool(assume_binary_truth))

    partials = pl.pallas_call(
        kernel,
        out_shape=jax.ShapeDtypeStruct((num_blocks, 1, LANES), jnp.float32),
        grid_spec=pltpu.PrefetchScalarGridSpec(
            num_scalar_prefetch=0,
            grid=(num_blocks,),
            in_specs=[
                pl.BlockSpec((block_rows, LANES), lambda i: (i, 0)),
                pl.BlockSpec((block_rows, LANES), lambda i: (i, 0)),
            ],
            out_specs=pl.BlockSpec((1, 1, LANES), lambda i: (i, 0, 0)),
        ),
        compiler_params=pltpu.CompilerParams(
            # Independent blocks: megacore-shards across TensorCores on v7x.
            dimension_semantics=("parallel",),
            vmem_limit_bytes=VMEM_LIMIT_BYTES,
        ),
    )(x2, t2)

    # Tiny final reduce + normalization by the *true* element count.
    return jnp.sum(partials) / jnp.float32(n)


def _reference(logit, truth):
    """Pure-JAX reference replicating the PyTorch forward."""
    x = logit.reshape(-1).astype(jnp.float32)
    t = truth.reshape(-1).astype(jnp.float32)
    log_pos = -jax.nn.log_sigmoid(x)
    log_neg = -jax.nn.log_sigmoid(-x)
    log_prob = t * log_pos + (1.0 - t) * log_neg
    prob = jnp.exp(-log_prob)
    margin_term = jnp.log(EM + (1.0 - EM) * prob)
    weight = t * WEIGHT_POS + (1.0 - t) * WEIGHT_NEG
    loss = margin_term + weight * (1.0 - prob) ** GAMMA * log_prob
    return jnp.mean(loss)


if __name__ == "__main__":
    key = jax.random.PRNGKey(0)
    k1, k2, k3 = jax.random.split(key, 3)
    # NCHW-like shapes (the module flattens them anyway): batch=2, C=4, H=W=16
    shape = (2, 4, 16, 16)
    logit = jax.random.normal(k1, shape, dtype=jnp.float32) * 2.0
    truth = (jax.random.uniform(k2, shape) > 0.5).astype(jnp.float32)

    # Binary labels (default fast path).
    out = jax.block_until_ready(margin_focal_loss(logit, truth))
    ref = _reference(logit, truth)
    assert jnp.allclose(out, ref, rtol=1e-5, atol=1e-5), (out, ref)

    # Soft labels (exact exp(-log_prob) path, full module semantics).
    soft = jax.random.uniform(k3, shape, dtype=jnp.float32)
    out_s = jax.block_until_ready(
        margin_focal_loss(logit, soft, assume_binary_truth=False))
    ref_s = _reference(logit, soft)
    assert jnp.allclose(out_s, ref_s, rtol=1e-5, atol=1e-5), (out_s, ref_s)

    print("KERNEL_OK")
</pallas_src>

<mosaic_0001>
module attributes {stable_mosaic.version = 11 : i64} {
  func.func @_margin_focal_kernel(%arg0: i32, %arg1: memref<16x128xf32, #tpu.memory_space<vmem>>, %arg2: memref<16x128xf32, #tpu.memory_space<vmem>>, %arg3: memref<1x1x128xf32, #tpu.memory_space<vmem>>) attributes {dimension_semantics = [#tpu.dimension_semantics<parallel>], iteration_bounds = array<i64: 1>, scalar_prefetch = 0 : i64, scratch_operands = 0 : i64, tpu.core_type = #tpu.core_type<tc>, window_params = [{transform_indices = @transform_0, window_bounds = array<i64: 16, 128>}, {transform_indices = @transform_1, window_bounds = array<i64: 16, 128>}, {transform_indices = @transform_2, window_bounds = array<i64: 1, 1, 128>}]} {
    %c0 = arith.constant 0 : index
    %c0_0 = arith.constant 0 : index
    %0 = vector.load %arg1[%c0, %c0_0] : memref<16x128xf32, #tpu.memory_space<vmem>>, vector<16x128xf32>
    %c0_1 = arith.constant 0 : index
    %c0_2 = arith.constant 0 : index
    %1 = vector.load %arg2[%c0_1, %c0_2] : memref<16x128xf32, #tpu.memory_space<vmem>>, vector<16x128xf32>
    %2 = math.absf %0 : vector<16x128xf32>
    %cst = arith.constant 0.000000e+00 : f32
    %3 = vector.broadcast %cst : f32 to vector<16x128xf32>
    %4 = arith.subf %3, %2 : vector<16x128xf32>
    %5 = math.exp %4 : vector<16x128xf32>
    %cst_3 = arith.constant 0.000000e+00 : f32
    %6 = vector.broadcast %cst_3 : f32 to vector<16x128xf32>
    %7 = arith.subf %6, %0 : vector<16x128xf32>
    %cst_4 = arith.constant 0.000000e+00 : f32
    %8 = vector.broadcast %cst_4 : f32 to vector<16x128xf32>
    %9 = arith.maximumf %7, %8 : vector<16x128xf32>
    %10 = math.log1p %5 : vector<16x128xf32>
    %11 = arith.addf %9, %10 : vector<16x128xf32>
    %cst_5 = arith.constant 1.000000e+00 : f32
    %12 = vector.broadcast %cst_5 : f32 to vector<16x128xf32>
    %13 = arith.subf %12, %1 : vector<16x128xf32>
    %14 = arith.mulf %13, %0 : vector<16x128xf32>
    %15 = arith.addf %11, %14 : vector<16x128xf32>
    %cst_6 = arith.constant 1.000000e+00 : f32
    %16 = vector.broadcast %cst_6 : f32 to vector<16x128xf32>
    %17 = arith.addf %16, %5 : vector<16x128xf32>
    %18 = tpu.reciprocal %17 {approx = true} : vector<16x128xf32> -> vector<16x128xf32>
    %19 = arith.mulf %17, %18 : vector<16x128xf32>
    %cst_7 = arith.constant 2.000000e+00 : f32
    %20 = vector.broadcast %cst_7 : f32 to vector<16x128xf32>
    %21 = arith.subf %20, %19 : vector<16x128xf32>
    %22 = arith.mulf %18, %21 : vector<16x128xf32>
    %cst_8 = arith.constant 0.000000e+00 : f32
    %23 = vector.broadcast %cst_8 : f32 to vector<16x128xf32>
    %24 = arith.cmpf oge, %0, %23 : vector<16x128xf32>
    %cst_9 = arith.constant 1.000000e+00 : f32
    %25 = vector.broadcast %cst_9 : f32 to vector<16x128xf32>
    %26 = arith.select %24, %25, %5 : vector<16x128xi1>, vector<16x128xf32>
    %27 = arith.mulf %26, %22 : vector<16x128xf32>
    %cst_10 = arith.constant 1.000000e+00 : f32
    %28 = vector.broadcast %cst_10 : f32 to vector<16x128xf32>
    %29 = arith.subf %28, %1 : vector<16x128xf32>
    %cst_11 = arith.constant 2.000000e+00 : f32
    %30 = vector.broadcast %cst_11 : f32 to vector<16x128xf32>
    %31 = arith.mulf %30, %1 : vector<16x128xf32>
    %cst_12 = arith.constant 1.000000e+00 : f32
    %32 = vector.broadcast %cst_12 : f32 to vector<16x128xf32>
    %33 = arith.subf %31, %32 : vector<16x128xf32>
    %34 = arith.mulf %33, %27 : vector<16x128xf32>
    %35 = arith.addf %29, %34 : vector<16x128xf32>
    %cst_13 = arith.constant -0.221402764 : f32
    %36 = vector.broadcast %cst_13 : f32 to vector<16x128xf32>
    %37 = arith.mulf %36, %35 : vector<16x128xf32>
    %cst_14 = arith.constant 1.22140276 : f32
    %38 = vector.broadcast %cst_14 : f32 to vector<16x128xf32>
    %39 = arith.addf %38, %37 : vector<16x128xf32>
    %40 = math.log %39 : vector<16x128xf32>
    %cst_15 = arith.constant 1.000000e+00 : f32
    %41 = vector.broadcast %cst_15 : f32 to vector<16x128xf32>
    %42 = arith.mulf %41, %1 : vector<16x128xf32>
    %cst_16 = arith.constant 1.000000e+00 : f32
    %43 = vector.broadcast %cst_16 : f32 to vector<16x128xf32>
    %44 = arith.addf %42, %43 : vector<16x128xf32>
    %cst_17 = arith.constant 1.000000e+00 : f32
    %45 = vector.broadcast %cst_17 : f32 to vector<16x128xf32>
    %46 = arith.subf %45, %35 : vector<16x128xf32>
    %47 = arith.mulf %46, %46 : vector<16x128xf32>
    %48 = arith.mulf %44, %47 : vector<16x128xf32>
    %49 = arith.mulf %48, %15 : vector<16x128xf32>
    %50 = arith.addf %40, %49 : vector<16x128xf32>
    %cst_18 = arith.constant dense<0.000000e+00> : vector<128xf32>
    %51 = vector.multi_reduction <add>, %50, %cst_18 [0] : vector<16x128xf32> to vector<128xf32>
    %52 = vector.shape_cast %51 : vector<128xf32> to vector<1x128xf32>
    %c0_19 = arith.constant 0 : index
    %c0_20 = arith.constant 0 : index
    %c0_21 = arith.constant 0 : index
    %53 = vector.load %arg3[%c0_19, %c0_20, %c0_21] : memref<1x1x128xf32, #tpu.memory_space<vmem>>, vector<1x1x128xf32>
    %54 = vector.shape_cast %53 : vector<1x1x128xf32> to vector<1x128xf32>
    %55 = vector.shape_cast %52 : vector<1x128xf32> to vector<1x1x128xf32>
    tpu.vector_store %arg3[%c0_19, %c0_20, %c0_21], %55 {strides = array<i32>} : memref<1x1x128xf32, #tpu.memory_space<vmem>>, vector<1x1x128xf32>,
    return
  }
  func.func @transform_0(%arg0: i32) -> (i32, i32) {
    %c0_i32 = arith.constant 0 : i32
    %c0_i32_0 = arith.constant 0 : i32
    return %arg0, %c0_i32 : i32, i32
  }
  func.func @transform_1(%arg0: i32) -> (i32, i32) {
    %c0_i32 = arith.constant 0 : i32
    %c0_i32_0 = arith.constant 0 : i32
    return %arg0, %c0_i32 : i32, i32
  }
  func.func @transform_2(%arg0: i32) -> (i32, i32, i32) {
    %c0_i32 = arith.constant 0 : i32
    %c0_i32_0 = arith.constant 0 : i32
    %c0_i32_1 = arith.constant 0 : i32
    return %arg0, %c0_i32, %c0_i32_0 : i32, i32, i32
  }
}

</mosaic_0001>

<bundles_post_ra>
// kernel: tpu_custom_call.1
= control target key start
LH: loop header
LB: loop body
LE: loop exit
PB: predicated region body
PF: predicated region fallthrough
CT: control target
= control target key end

     0   :  { %7 = vsyncpa [#allocation3], 0  ;;  %s325_s0 = inlined_call_operand.hbm [shape: f32[16,128], index: 0, kind: input, shape index: {}]   ;;  %s326_s1 = inlined_call_operand.hbm [shape: f32[16,128], index: 1, kind: input, shape index: {}]   ;;  %s327_s2 = inlined_call_operand.hbm [shape: f32[1,1,128], index: 2, kind: output, shape index: {}]  }
   0x1   :  { %8 = vsyncpa [#allocation6], 0 }
   0x2   :  { %9 = vsyncpa [#allocation4], 0  ;;  %s245_s9 = smov [#allocation2]   ;;  %s173_s13 = scalar_lea.hbm %s325_s0, 256 }
   0x3   :  { %s15_s10 = sshll.u32 %s245_s9, 4  ;;  %p174_p0 = scmp.ne.s32.totalorder %s325_s0, %s173_s13  ;;  %s16_s10 = int_to_ptr.vmem [resolvable:$true] %s15_s10 }
   0x4   :  { %p177_p1 = scmp.lt.u32.totalorder %s173_s13, %s325_s0 }
   0x6   :  { %p179_p2 = pnand %p177_p1, %p174_p0 }
   0x8   :  { %182 = shalt.err (!%p179_p2)
}
   0x9   :  { %s183_s18 = scalar_lea.vmem %s16_s10, 256  ;;  %p188_p4 = scmp.lt.s32.totalorder %s16_s10, %s16_s10 }
   0xa   :  { %p184_p3 = scmp.ne.s32.totalorder %s16_s10, %s183_s18  ;;  %p189_p5 = scmp.lt.s32.totalorder %s183_s18, %s183_s18 }
   0xc   :  { %p190_p6 = por %p189_p5, %p188_p4 }
   0xe   :  { %p191_p7 = pnand %p190_p6, %p184_p3 }
  0x10   :  { %194 = shalt.err (!%p191_p7)
}
  0x11   :  { %s246_s19 = smov 128   ;;  %s247_s20 = smov 8  }
  0x12   :  { %21 = dma.hbm_to_vmem [thread:$0]  %s325_s0, 256, %s16_s10, [#allocation3], %s246_s19, %s246_s19, %s247_s20  }
  0x13   :  { %s248_s23 = smov [#allocation5]   ;;  %s195_s27 = scalar_lea.hbm %s326_s1, 256 }
  0x14   :  { %s27_s24 = sshll.u32 %s248_s23, 4  ;;  %p196_p8 = scmp.ne.s32.totalorder %s326_s1, %s195_s27  ;;  %s28_s24 = int_to_ptr.vmem [resolvable:$true] %s27_s24 }
  0x15   :  { %p199_p9 = scmp.lt.u32.totalorder %s195_s27, %s326_s1 }
  0x17   :  { %p201_p10 = pnand %p199_p9, %p196_p8 }
  0x19   :  { %204 = shalt.err (!%p201_p10)
}
  0x1a   :  { %s205_s4 = scalar_lea.vmem %s28_s24, 256  ;;  %p210_p12 = scmp.lt.s32.totalorder %s28_s24, %s28_s24 }
  0x1b   :  { %p206_p11 = scmp.ne.s32.totalorder %s28_s24, %s205_s4  ;;  %p211_p13 = scmp.lt.s32.totalorder %s205_s4, %s205_s4 }
  0x1d   :  { %p212_p0 = por %p211_p13, %p210_p12 }
  0x1f   :  { %p213_p1 = pnand %p212_p0, %p206_p11 }
  0x21   :  { %216 = shalt.err (!%p213_p1)
}
  0x22   :  { %33 = dma.hbm_to_vmem [thread:$0]  %s326_s1, 256, %s28_s24, [#allocation6], %s246_s19, %s246_s19, %s247_s20  }
  0x23   :  { %239 = dma.done.wait [#allocation3], 256  }
  0x24   :  { %240 = vsyncadd [#allocation3], 4294967040 }
  0x25   :  { %241 = dma.done.wait [#allocation6], 256  }
  0x26   :  { %242 = vsyncadd [#allocation6], 4294967040  ;;  %v289_v0 = vld [vmem:[#allocation2] sm:$0xff]  ;;  %v291_v1 = vld [vmem:[#allocation2 + $0x8] sm:$0xff]  ;;  %s249_s1 = smov [#allocation7]  }
  0x27   :  { %v44_v2 = vand.u32 2147483647, %v289_v0  ;;  %v45_v3 = vand.u32 2147483647, %v291_v1  ;;  %v42_v12 = vld [vmem:[#allocation5] sm:$0xff]  ;;  %v43_v13 = vld [vmem:[#allocation5 + $0x8] sm:$0xff] }
  0x28   :  { %vm92_vm0 = vcmp.ge.f32.partialorder %v289_v0, 0.0  ;;  %v98_v17 = vmul.f32 2.0, %v42_v12  ;;  %vm93_vm1 = vcmp.ge.f32.partialorder %v291_v1, 0.0  ;;  %v99_v19 = vmul.f32 2.0, %v43_v13  ;;  %s140_s6 = sshll.u32 %s249_s1, 4  ;;  %s141_s6 = int_to_ptr.vmem [resolvable:$true] %s140_s6 }
  0x29   :  { %v46_v4 = vsub.f32 0.0, %v44_v2  ;;  %v47_v5 = vsub.f32 0.0, %v45_v3  ;;  %v76_v31 = vsub.f32 1.0, %v42_v12  ;;  %v77_v36 = vsub.f32 1.0, %v43_v13  ;;  %s217_s7 = scalar_lea.vmem %s141_s6, 16  ;;  %s221_s8 = scalar_lea.vmem %s141_s6, 32 }
  0x2a   :  { %v150_v27 = vadd.f32 -1.0, %v98_v17  ;;  %v151_v29 = vadd.f32 -1.0, %v99_v19  ;;  %v52_v41 = vsub.f32 0.0, %v289_v0  ;;  %v53_v43 = vsub.f32 0.0, %v291_v1  ;;  %p218_p2 = scmp.ne.s32.totalorder %s141_s6, %s217_s7  ;;  %p222_p3 = scmp.lt.s32.totalorder %s141_s6, %s141_s6 }
  0x2b   :  { %v48_v6 = vmul.f32 1.442695, %v46_v4  ;;  %v50_v7 = vmul.f32 1.442695, %v47_v5  ;;  %v78_v62 = vmul.f32 %v76_v31, %v289_v0  ;;  %v114_v2 = vadd.f32 1.0, %v42_v12  ;;  %p223_p4 = scmp.lt.s32.totalorder %s221_s8, %s217_s7 }
  0x2c   :  { %v54_v53 = vmax.f32 %v52_v41, 0.0  ;;  %v55_v56 = vmax.f32 %v53_v43, 0.0  ;;  %v79_v5 = vmul.f32 %v77_v36, %v291_v1 }
  0x2d   :  { %157 = vpow2.f32 %v48_v6  ;;  %v115_v6 = vadd.f32 1.0, %v43_v13  ;;  %p224_p5 = por %p223_p4, %p222_p3 }
  0x2e   :  { %159 = vpow2.f32 %v50_v7 }
  0x2f   :  { %p225_p6 = pnand %p224_p5, %p218_p2 }
  0x37   :  { %v158_v8 = vpop.eup %157 }
  0x38   :  { %v160_v9 = vpop.eup %159  ;;  %v56_v10 = vadd.f32 1.0, %v158_v8  ;;  %v59_v20 = vmul.f32 -0.5, %v158_v8  ;;  %v94_v24 = vsel %vm92_vm0, 1.0, %v158_v8  ;;  %v62_v34 = vand.u32 2147483647, %v158_v8 }
  0x39   :  { %v65_v11 = vadd.f32 1.0, %v160_v9  ;;  %v68_v22 = vmul.f32 -0.5, %v160_v9  ;;  %v95_v26 = vsel %vm93_vm1, 1.0, %v160_v9  ;;  %v71_v39 = vand.u32 2147483647, %v160_v9 }
  0x3a   :  { %161 = vrcp.f32 %v56_v10  ;;  %v60_v30 = vadd.f32 1.0, %v59_v20  ;;  %vm299_vm2 = vcmp.lt.f32.partialorder %v62_v34, 0.0004427343 }
  0x3b   :  { %163 = vrcp.f32 %v65_v11  ;;  %v69_v35 = vadd.f32 1.0, %v68_v22  ;;  %vm303_vm3 = vcmp.lt.f32.partialorder %v71_v39, 0.0004427343 }
  0x3c   :  { %165 = vlog2.f32 %v56_v10  ;;  %v61_v45 = vmul.f32 %v158_v8, %v60_v30 }
  0x3d   :  { %167 = vlog2.f32 %v65_v11  ;;  %v70_v49 = vmul.f32 %v160_v9, %v69_v35 }
  0x44   :  { %v162_v14 = vpop.eup %161 }
  0x45   :  { %v164_v15 = vpop.eup %163  ;;  %v86_v16 = vmul.f32 %v162_v14, %v56_v10 }
  0x46   :  { %v87_v18 = vmul.f32 %v164_v15, %v65_v11  ;;  %v166_v33 = vpop.eup %165 }
  0x47   :  { %v88_v21 = vsub.f32 2.0, %v86_v16  ;;  %v168_v38 = vpop.eup %167  ;;  %v58_v44 = vmul.f32 0.6931472, %v166_v33 }
  0x48   :  { %v89_v23 = vsub.f32 2.0, %v87_v18  ;;  %v67_v48 = vmul.f32 0.6931472, %v168_v38 }
  0x49   :  { %v90_v25 = vmul.f32 %v162_v14, %v88_v21  ;;  %v64_v57 = vsel %vm299_vm2, %v61_v45, %v58_v44 }
  0x4a   :  { %v91_v28 = vmul.f32 %v164_v15, %v89_v23  ;;  %v73_v60 = vsel %vm303_vm3, %v70_v49, %v67_v48  ;;  %v74_v63 = vadd.f32 %v64_v57, %v54_v53 }
  0x4b   :  { %v96_v32 = vmul.f32 %v94_v24, %v90_v25  ;;  %v75_v4 = vadd.f32 %v73_v60, %v55_v56 }
  0x4c   :  { %v97_v37 = vmul.f32 %v95_v26, %v91_v28  ;;  %v80_v8 = vadd.f32 %v78_v62, %v74_v63 }
  0x4d   :  { %v102_v40 = vmul.f32 %v150_v27, %v96_v32  ;;  %v81_v10 = vadd.f32 %v79_v5, %v75_v4 }
  0x4e   :  { %v103_v42 = vmul.f32 %v151_v29, %v97_v37 }
  0x4f   :  { %v104_v46 = vadd.f32 %v102_v40, %v76_v31 }
  0x50   :  { %v105_v50 = vadd.f32 %v103_v42, %v77_v36 }
  0x51   :  { %v106_v52 = vmul.f32 -0.22140276, %v104_v46  ;;  %v116_v55 = vsub.f32 1.0, %v104_v46 }
  0x52   :  { %v107_v54 = vmul.f32 -0.22140276, %v105_v50  ;;  %v117_v59 = vsub.f32 1.0, %v105_v50 }
  0x53   :  { %v108_v58 = vadd.f32 1.2214028, %v106_v52  ;;  %v118_v3 = vmul.f32 %v116_v55, %v116_v55 }
  0x54   :  { %v109_v61 = vadd.f32 1.2214028, %v107_v54  ;;  %v119_v7 = vmul.f32 %v117_v59, %v117_v59 }
  0x55   :  { %169 = vlog2.f32 %v108_v58  ;;  %v120_v9 = vmul.f32 %v118_v3, %v114_v2 }
  0x56   :  { %171 = vlog2.f32 %v109_v61  ;;  %v121_v11 = vmul.f32 %v119_v7, %v115_v6 }
  0x57   :  { %v122_v14 = vmul.f32 %v120_v9, %v80_v8 }
  0x58   :  { %v123_v16 = vmul.f32 %v121_v11, %v81_v10 }
  0x5f   :  { %v170_v15 = vpop.eup %169 }
  0x60   :  { %v172_v17 = vpop.eup %171  ;;  %v111_v18 = vmul.f32 0.6931472, %v170_v15 }
  0x61   :  { %v113_v0 = vmul.f32 0.6931472, %v172_v17 }
  0x62   :  { %v124_v19 = vadd.f32 %v122_v14, %v111_v18 }
  0x63   :  { %v125_v20 = vadd.f32 %v123_v16, %v113_v0 }
  0x65   :  { %v126_v21 = vadd.f32 %v125_v20, %v124_v19 }
  0x67   :  { %v127_v12 = vrot.slane %v126_v21, 4 }
  0x69   :  { %v128_v22 = vadd.f32 %v127_v12, %v126_v21 }
  0x6b   :  { %v129_v23 = vrot.slane %v128_v22, 2 }
  0x6d   :  { %v130_v24 = vadd.f32 %v129_v23, %v128_v22 }
  0x6f   :  { %v131_v1 = vrot.slane %v130_v24, 1 }
  0x71   :  { %v132_v13 = vadd.f32 %v131_v1, %v130_v24 }
  0x73   :  { %133 = vst [vmem:[#allocation7] sm:$0x1] %v132_v13 }
  0x74   :  { %228 = shalt.err (!%p225_p6)
}
  0x75   :  { %s229_s11 = scalar_lea.hbm %s327_s2, 16 }
  0x76   :  { %p230_p7 = scmp.ne.s32.totalorder %s327_s2, %s229_s11  ;;  %p233_p8 = scmp.lt.u32.totalorder %s229_s11, %s327_s2 }
  0x78   :  { %p235_p9 = pnand %p233_p8, %p230_p7 }
  0x7a   :  { %238 = shalt.err (!%p235_p9)
}
  0x7b   :  { %143 = dma.vmem_to_hbm [thread:$0]  %s141_s6, 16, %s327_s2, [#allocation4]  }
  0x7c   :  { %243 = dma.done.wait [#allocation4], 16  }
  0x7d   :  { %244 = vsyncadd [#allocation4], 4294967280 }
  0x7e   :  { %147 = vsyncpa [#allocation3], 1 }
  0x7f   :  { %148 = vsyncpa [#allocation6], 1 }
  0x80   :  { %149 = vsyncpa [#allocation4], 1 }

</bundles_post_ra>
